<compile_context>
chip_gen: v6e
topology: v6e:2x2x1
jax: 0.10.0
libtpu: 0.0.40
codegen_flags: <defaults>
</compile_context>

<pallas_src>
import math
from functools import partial

import jax
import jax.numpy as jnp
from jax.experimental import pallas as pl
from jax.experimental.pallas import tpu as pltpu


def _copy_kernel(x_ref, o_ref):
    # Identity copy of one lane-dense tile through VMEM.  The reshape itself
    # is layout metadata performed outside the kernel on the contiguous data.
    o_ref[...] = x_ref[...]


def _resolve_shape(total_elems, shape):
    """Resolve a single -1 entry like torch.Tensor.view does."""
    shape = list(shape)
    neg = [i for i, s in enumerate(shape) if s == -1]
    if len(neg) > 1:
        raise ValueError("only one dimension can be inferred")
    if neg:
        known = math.prod(s for s in shape if s != -1)
        if known == 0 or total_elems % known != 0:
            raise ValueError(f"cannot reshape {total_elems} elems into {shape}")
        shape[neg[0]] = total_elems // known
    if math.prod(shape) != total_elems:
        raise ValueError(f"shape {shape} invalid for {total_elems} elements")
    return tuple(shape)


def _pick_factorization(total):
    """Pick (rows, lane_w): lane_w a multiple of 128 that divides `total`,
    preferring rows % 8 == 0 (fully packed (8,128) vreg tiles), then wider
    lanes (unmasked, lane-dense vst on the output)."""
    best_key, best = None, None
    for w in (2048, 1024, 512, 256, 128):
        if total % w:
            continue
        rows = total // w
        key = (rows % 8 == 0, w)  # sublane-dense first, then wider lanes
        if best_key is None or key > best_key:
            best_key, best = key, (rows, w)
    return best


# Keep double-buffered in + out (~4x tile bytes) comfortably under the most
# conservative default scoped-VMEM budget (v5e: 16 MiB) without raising
# vmem_limit_bytes, while staying large enough to amortize the ~0.35 us
# per-grid-step overhead on v6e/v7x.
_TARGET_TILE_BYTES = 2 * 1024 * 1024


@partial(jax.jit, static_argnums=(1, 2, 3, 4))
def _view_impl(x, out_shape, rows, lane_w, block_rows):
    x_flat = x.reshape((rows, lane_w))  # metadata-only under jit
    copied = pl.pallas_call(
        _copy_kernel,
        out_shape=jax.ShapeDtypeStruct((rows, lane_w), x.dtype),
        grid=(pl.cdiv(rows, block_rows),),
        in_specs=[pl.BlockSpec((block_rows, lane_w), lambda i: (i, 0))],
        out_specs=pl.BlockSpec((block_rows, lane_w), lambda i: (i, 0)),
        compiler_params=pltpu.CompilerParams(
            # Row tiles are independent: shard across TensorCores on v7x
            # (neutral on single-TC v5e/v6e).
            dimension_semantics=("parallel",),
        ),
    )(x_flat)
    # Final reshape to the requested view shape (metadata only under jit).
    return copied.reshape(out_shape)


class View:
    """JAX/Pallas equivalent of cortex_DIM View module."""

    def __init__(self, *shape):
        self.shape = shape

    def __call__(self, x):
        total = math.prod(x.shape)
        out_shape = _resolve_shape(total, self.shape)

        fac = _pick_factorization(total)
        if fac is None or total == 0:
            # Non-128-divisible (or empty) sizes: a row-major reshape is
            # metadata-only in XLA — skip the copy instead of wasting 7/8 of
            # each vreg on a (1, total) slab or padding round trips.
            return x.reshape(out_shape)
        rows, lane_w = fac

        itemsize = jnp.dtype(x.dtype).itemsize
        # Pick block_rows: either the full row extent (legal even if < 8) or
        # a multiple of 8 sized to ~_TARGET_TILE_BYTES per tile.
        rows_per_target = max(1, _TARGET_TILE_BYTES // (lane_w * itemsize))
        if rows_per_target >= rows:
            block_rows = rows
        else:
            block_rows = max(8, (rows_per_target // 8) * 8)
            block_rows = min(block_rows, rows)

        return _view_impl(x, out_shape, rows, lane_w, block_rows)


if __name__ == "__main__":
    key = jax.random.PRNGKey(0)
    # NCHW input, small shapes: batch=2, channels=4, spatial=16x16
    x = jax.random.normal(key, (2, 4, 16, 16), dtype=jnp.float32)

    # Reference computed up front (torch .view on contiguous tensors ==
    # row-major reshape).
    ref = x.reshape(-1, 4 * 16 * 16)

    # Typical cortex_DIM usage: flatten feature maps -> (N, C*H*W)
    view = View(-1, 4 * 16 * 16)
    out = view(x)
    out = jax.block_until_ready(out)

    assert out.shape == (2, 1024), out.shape
    assert out.dtype == x.dtype
    assert bool(jnp.all(out == ref))

    print("KERNEL_OK")
</pallas_src>

<mosaic_0001>
module attributes {stable_mosaic.version = 11 : i64} {
  func.func @_copy_kernel(%arg0: i32, %arg1: memref<8x256xf32, #tpu.memory_space<vmem>>, %arg2: memref<8x256xf32, #tpu.memory_space<vmem>>) attributes {dimension_semantics = [#tpu.dimension_semantics<parallel>], iteration_bounds = array<i64: 1>, scalar_prefetch = 0 : i64, scratch_operands = 0 : i64, tpu.core_type = #tpu.core_type<tc>, window_params = [{transform_indices = @transform_0, window_bounds = array<i64: 8, 256>}, {transform_indices = @transform_1, window_bounds = array<i64: 8, 256>}]} {
    %c0 = arith.constant 0 : index
    %c0_0 = arith.constant 0 : index
    %0 = vector.load %arg1[%c0, %c0_0] : memref<8x256xf32, #tpu.memory_space<vmem>>, vector<8x256xf32>
    %c0_1 = arith.constant 0 : index
    %c0_2 = arith.constant 0 : index
    %1 = vector.load %arg2[%c0_1, %c0_2] : memref<8x256xf32, #tpu.memory_space<vmem>>, vector<8x256xf32>
    tpu.vector_store %arg2[%c0_1, %c0_2], %0 {strides = array<i32>} : memref<8x256xf32, #tpu.memory_space<vmem>>, vector<8x256xf32>,
    return
  }
  func.func @transform_0(%arg0: i32) -> (i32, i32) {
    %c0_i32 = arith.constant 0 : i32
    %c0_i32_0 = arith.constant 0 : i32
    return %arg0, %c0_i32 : i32, i32
  }
  func.func @transform_1(%arg0: i32) -> (i32, i32) {
    %c0_i32 = arith.constant 0 : i32
    %c0_i32_0 = arith.constant 0 : i32
    return %arg0, %c0_i32 : i32, i32
  }
}

</mosaic_0001>

<bundles_post_ra>
// kernel: _view_impl.1
= control target key start
LH: loop header
LB: loop body
LE: loop exit
PB: predicated region body
PF: predicated region fallthrough
CT: control target
= control target key end

     0   :  { %s38_s0 = inlined_call_operand.vmem [shape: f32[8,256], index: 0, kind: input, shape index: {}]   ;;  %s39_s1 = inlined_call_operand.vmem [shape: f32[8,256], index: 1, kind: output, shape index: {}]  }
   0x1   :  { %v8_v0 = vld [vmem:[%s38_s0] sm:$0xff]  ;;  %v9_v1 = vld [vmem:[%s38_s0 + $0x8] sm:$0xff] }
   0x2   :  { %10 = vst [vmem:[%s39_s1] sm:$0xff] %v8_v0  ;;  %11 = vst [vmem:[%s39_s1 + $0x8] sm:$0xff] %v9_v1 }

</bundles_post_ra>
